<compile_context>
chip_gen: v6e
topology: v6e:2x2x1
jax: 0.10.0
libtpu: 0.0.40
codegen_flags: <defaults>
</compile_context>

<pallas_src>
import jax
import jax.numpy as jnp
from jax.experimental import pallas as pl
from jax.experimental.pallas import tpu as pltpu

_LANES = 128
_SMALL_BYTES = 1 << 20  # below this, plain XLA fusion beats kernel launch


def _make_sin_kernel(w0):
    # w0 is a Python float folded into the kernel at trace time.
    def kernel(x_ref, o_ref):
        o_ref[...] = jnp.sin(w0 * x_ref[...])
    return kernel


def sin_module(x, w0=1.0, block_rows=4096, force_pallas=False):
    """Pallas equivalent of Sin(w0).forward(x). Accepts any shape / layout."""
    total = x.size
    dtype = x.dtype

    if total == 0:
        return jnp.sin(w0 * x)

    # Small-input fast path: launch + reshape overhead dominates for tiny tensors.
    if (not force_pallas) and total * jnp.dtype(dtype).itemsize < _SMALL_BYTES:
        return jnp.sin(w0 * x)

    orig_shape = x.shape

    # dtype-dependent minimum sublane tile (f32:8, bf16:16, int8/fp8:32)
    itemsize = jnp.dtype(dtype).itemsize
    sublane = {4: 8, 2: 16, 1: 32}.get(itemsize, 8)

    # Flatten to a lane-dense (rows, 128) slab. Only pad when total % 128 != 0.
    rows = -(-total // _LANES)  # ceil
    lane_pad = rows * _LANES - total
    x_flat = x.reshape(-1)
    if lane_pad:
        x_flat = jnp.pad(x_flat, (0, lane_pad))
    x2d = x_flat.reshape(rows, _LANES)

    # Tile rows: either the full extent (always legal) or a sublane-aligned
    # chunk; a ragged last tile is handled by Pallas edge-block masking, so no
    # host-side row padding is needed.
    if rows <= block_rows:
        tile_rows = rows
    else:
        tile_rows = max((block_rows // sublane) * sublane, sublane)

    grid = (pl.cdiv(rows, tile_rows),)

    out2d = pl.pallas_call(
        _make_sin_kernel(float(w0)),
        out_shape=jax.ShapeDtypeStruct((rows, _LANES), dtype),
        grid_spec=pltpu.PrefetchScalarGridSpec(
            num_scalar_prefetch=0,
            grid=grid,
            in_specs=[pl.BlockSpec((tile_rows, _LANES), lambda i: (i, 0))],
            out_specs=pl.BlockSpec((tile_rows, _LANES), lambda i: (i, 0)),
        ),
        compiler_params=pltpu.CompilerParams(
            dimension_semantics=("parallel",),
        ),
    )(x2d)

    out_flat = out2d.reshape(-1)
    if lane_pad:
        out_flat = out_flat[:total]
    return out_flat.reshape(orig_shape)


if __name__ == "__main__":
    key = jax.random.PRNGKey(0)
    k1, k2, k3 = jax.random.split(key, 3)

    # 1) Small NCHW input (module's typical use), forced through the Pallas path.
    w0 = 1.0
    x = jax.random.normal(k1, (2, 4, 16, 16), dtype=jnp.float32)
    y = jax.block_until_ready(sin_module(x, w0=w0, force_pallas=True))
    assert y.shape == x.shape and y.dtype == x.dtype
    assert jnp.allclose(y, jnp.sin(w0 * x), atol=1e-6), "mismatch (aligned case)"

    # 2) Ragged size (total % 128 != 0) with non-trivial w0 (SIREN-style).
    w0b = 30.0
    xb = jax.random.normal(k2, (3, 5, 17), dtype=jnp.float32)
    yb = jax.block_until_ready(sin_module(xb, w0=w0b, force_pallas=True))
    assert jnp.allclose(yb, jnp.sin(w0b * xb), atol=1e-5), "mismatch (ragged case)"

    # 3) Multi-step grid with a ragged last tile (exercises edge-block masking).
    xc = jax.random.normal(k3, (5000,), dtype=jnp.float32)
    yc = jax.block_until_ready(
        sin_module(xc, w0=2.0, block_rows=16, force_pallas=True))
    assert jnp.allclose(yc, jnp.sin(2.0 * xc), atol=1e-6), "mismatch (edge-block case)"

    print("KERNEL_OK")
</pallas_src>

<mosaic_0001>
module attributes {stable_mosaic.version = 11 : i64} {
  func.func @kernel(%arg0: i32, %arg1: memref<16x128xf32, #tpu.memory_space<vmem>>, %arg2: memref<16x128xf32, #tpu.memory_space<vmem>>) attributes {dimension_semantics = [#tpu.dimension_semantics<parallel>], iteration_bounds = array<i64: 1>, scalar_prefetch = 0 : i64, scratch_operands = 0 : i64, tpu.core_type = #tpu.core_type<tc>, window_params = [{transform_indices = @transform_0, window_bounds = array<i64: 16, 128>}, {transform_indices = @transform_1, window_bounds = array<i64: 16, 128>}]} {
    %c0 = arith.constant 0 : index
    %c0_0 = arith.constant 0 : index
    %0 = vector.load %arg1[%c0, %c0_0] : memref<16x128xf32, #tpu.memory_space<vmem>>, vector<16x128xf32>
    %cst = arith.constant 1.000000e+00 : f32
    %1 = vector.broadcast %cst : f32 to vector<16x128xf32>
    %2 = arith.mulf %1, %0 : vector<16x128xf32>
    %3 = math.sin %2 : vector<16x128xf32>
    %c0_1 = arith.constant 0 : index
    %c0_2 = arith.constant 0 : index
    %4 = vector.load %arg2[%c0_1, %c0_2] : memref<16x128xf32, #tpu.memory_space<vmem>>, vector<16x128xf32>
    tpu.vector_store %arg2[%c0_1, %c0_2], %3 {strides = array<i32>} : memref<16x128xf32, #tpu.memory_space<vmem>>, vector<16x128xf32>,
    return
  }
  func.func @transform_0(%arg0: i32) -> (i32, i32) {
    %c0_i32 = arith.constant 0 : i32
    %c0_i32_0 = arith.constant 0 : i32
    return %arg0, %c0_i32 : i32, i32
  }
  func.func @transform_1(%arg0: i32) -> (i32, i32) {
    %c0_i32 = arith.constant 0 : i32
    %c0_i32_0 = arith.constant 0 : i32
    return %arg0, %c0_i32 : i32, i32
  }
}

</mosaic_0001>

<bundles_post_ra>
// kernel: tpu_custom_call.1
= control target key start
LH: loop header
LB: loop body
LE: loop exit
PB: predicated region body
PF: predicated region fallthrough
CT: control target
= control target key end

     0   :  { %6 = vsyncpa [#allocation3], 0  ;;  %s440_s0 = inlined_call_operand.hbm [shape: f32[16,128], index: 0, kind: input, shape index: {}]   ;;  %s441_s1 = inlined_call_operand.hbm [shape: f32[16,128], index: 1, kind: output, shape index: {}]  }
   0x1   :  { %7 = vsyncpa [#allocation4], 0  ;;  %s330_s6 = smov [#allocation2]  }
   0x2   :  { %s13_s7 = sshll.u32 %s330_s6, 4  ;;  %s14_s7 = int_to_ptr.vmem [resolvable:$true] %s13_s7 }
   0x3   :  { %s294_s8 = scalar_lea.vmem %s14_s7, 256  ;;  %p299_p1 = scmp.lt.s32.totalorder %s14_s7, %s14_s7 }
   0x4   :  { %p295_p0 = scmp.ne.s32.totalorder %s14_s7, %s294_s8  ;;  %p300_p2 = scmp.lt.s32.totalorder %s294_s8, %s294_s8 }
   0x6   :  { %p301_p3 = por %p300_p2, %p299_p1 }
   0x8   :  { %p302_p4 = pnand %p301_p3, %p295_p0 }
   0xa   :  { %305 = shalt.err (!%p302_p4)
}
   0xb   :  { %s331_s9 = smov 128   ;;  %s332_s10 = smov 8  }
   0xc   :  { %19 = dma.hbm_to_vmem [thread:$0]  %s440_s0, 256, %s14_s7, [#allocation3], %s331_s9, %s331_s9, %s332_s10  }
   0xd   :  { %326 = dma.done.wait [#allocation3], 256  }
   0xe   :  { %327 = vsyncadd [#allocation3], 4294967040  ;;  %v356_v0 = vld [vmem:[#allocation2] sm:$0xff]  ;;  %v358_v1 = vld [vmem:[#allocation2 + $0x8] sm:$0xff]  ;;  %v333_v24 = vmov 683565275  }
   0xf   :  { %v25_v2 = vand.u32 2147483647, %v356_v0  ;;  %v28_v3 = vand.u32 2139095040, %v356_v0  ;;  %v129_v4 = vand.u32 2147483647, %v358_v1  ;;  %v132_v5 = vand.u32 2139095040, %v358_v1 }
  0x10   :  { %v334_v26 = vmov 2475754826   ;;  %v335_v28 = vmov 2131351028   ;;  %v336_v30 = vmov 2102212464  }
  0x11   :  { %v29_v6 = vshrl.u32 %v28_v3, 23  ;;  %v32_v7 = vand.u32 8388607, %v25_v2  ;;  %v133_v8 = vshrl.u32 %v132_v5, 23  ;;  %v136_v9 = vand.u32 8388607, %v129_v4 }
  0x12   :  { %v337_v32 = vmov 920167782   ;;  %v338_v40 = vmov 1326507024   ;;  %vm27_vm14 = vcmp.lt.s32.totalorder %v356_v0, 0  ;;  %s339_s0 = smov [#allocation5]  }
  0x13   :  { %v252_v10 = vadd.s32 4294967169, %v29_v6  ;;  %v256_v11 = vadd.s32 4294967169, %v133_v8  ;;  %v33_v13 = vor.u32 8388608, %v32_v7  ;;  %v137_v14 = vor.u32 8388608, %v136_v9  ;;  %s240_s13 = sshll.u32 %s339_s0, 4  ;;  %s241_s13 = int_to_ptr.vmem [resolvable:$true] %s240_s13 }
  0x14   :  { %vm419_vm15 = vcmp.le.f32.partialorder %v25_v2, 0.7853982  ;;  %s306_s14 = scalar_lea.vmem %s241_s13, 256  ;;  %p311_p6 = scmp.lt.s32.totalorder %s241_s13, %s241_s13 }
  0x15   :  { %v35_v12 = vadd.s32 1, %v252_v10  ;;  %v139_v15 = vadd.s32 1, %v256_v11  ;;  %v368_v20 = vshll.u32 %v33_v13, 8  ;;  %v370_v22 = vshll.u32 %v137_v14, 8  ;;  %p307_p5 = scmp.ne.s32.totalorder %s241_s13, %s306_s14  ;;  %p312_p7 = scmp.lt.s32.totalorder %s306_s14, %s306_s14 }
  0x17   :  { %vm36_vm0 = vcmp.gt.s32.totalorder %v35_v12, 0  ;;  %vm140_vm1 = vcmp.gt.s32.totalorder %v139_v15, 0  ;;  %p313_p8 = por %p312_p7, %p311_p6 }
  0x18   :  { %v37_v16 = vsel %vm36_vm0, %v35_v12, 0  ;;  %v141_v19 = vsel %vm140_vm1, %v139_v15, 0  ;;  %vm131_vm0 = vcmp.lt.s32.totalorder %v358_v1, 0  ;;  %vm130_vm1 = vcmp.le.f32.partialorder %v129_v4, 0.7853982 }
  0x19   :  { %v38_v17 = vshrl.u32 %v37_v16, 5  ;;  %v39_v18 = vand.u32 31, %v37_v16  ;;  %v143_v21 = vand.u32 31, %v141_v19  ;;  %v372_v34 = vshrl.u32 %v141_v19, 5  ;;  %p314_p9 = pnand %p313_p8, %p307_p5 }
  0x1b   :  { %v40_v23 = vsub.s32 32, %v39_v18  ;;  %v42_v25 = vshll.u32 %v333_v24, %v39_v18  ;;  %v45_v27 = vshll.u32 %v334_v26, %v39_v18  ;;  %v48_v29 = vshll.u32 %v335_v28, %v39_v18 }
  0x1c   :  { %v51_v31 = vshll.u32 %v336_v30, %v39_v18  ;;  %v54_v33 = vshll.u32 %v337_v32, %v39_v18  ;;  %vm57_vm2 = vcmp.lt.s32.totalorder %v38_v17, 1  ;;  %vm58_vm3 = vcmp.lt.s32.totalorder %v38_v17, 2 }
  0x1d   :  { %v41_v35 = vshrl.u32 %v333_v24, %v40_v23  ;;  %v43_v36 = vshrl.u32 %v334_v26, %v40_v23  ;;  %v46_v37 = vshrl.u32 %v335_v28, %v40_v23  ;;  %v49_v38 = vshrl.u32 %v336_v30, %v40_v23 }
  0x1e   :  { %v52_v39 = vshrl.u32 %v337_v32, %v40_v23  ;;  %v55_v41 = vshrl.u32 %v338_v40, %v40_v23  ;;  %vm60_vm4 = vcmp.lt.s32.totalorder %v38_v17, 4  ;;  %v144_v45 = vsub.s32 32, %v143_v21 }
  0x1f   :  { %v44_v42 = vor.u32 %v43_v36, %v42_v25  ;;  %v47_v43 = vor.u32 %v46_v37, %v45_v27  ;;  %v50_v44 = vor.u32 %v49_v38, %v48_v29  ;;  %vm59_vm5 = vcmp.lt.s32.totalorder %v38_v17, 3 }
  0x20   :  { %v53_v46 = vor.u32 %v52_v39, %v51_v31  ;;  %v56_v47 = vor.u32 %v55_v41, %v54_v33  ;;  %v146_v48 = vshll.u32 %v333_v24, %v143_v21  ;;  %v149_v56 = vshll.u32 %v334_v26, %v143_v21 }
  0x21   :  { %v61_v49 = vsel %vm57_vm2, %v41_v35, %v44_v42  ;;  %v62_v50 = vsel %vm60_vm4, %v50_v44, 2102212464  ;;  %v65_v51 = vsel %vm57_vm2, %v44_v42, %v47_v43  ;;  %v69_v52 = vsel %vm57_vm2, %v47_v43, %v50_v44 }
  0x22   :  { %v63_v53 = vsel %vm59_vm5, %v47_v43, %v62_v50  ;;  %v66_v54 = vsel %vm60_vm4, %v53_v46, 920167782  ;;  %v70_v55 = vsel %vm60_vm4, %v56_v47, 1326507024  ;;  %v145_v59 = vshrl.u32 %v333_v24, %v144_v45 }
  0x23   :  { %v67_v57 = vsel %vm59_vm5, %v50_v44, %v66_v54  ;;  %v71_v58 = vsel %vm59_vm5, %v53_v46, %v70_v55  ;;  %v147_v60 = vshrl.u32 %v334_v26, %v144_v45  ;;  %v64_v61 = vsel %vm58_vm3, %v61_v49, %v63_v53 }
  0x24   :  { %v68_v62 = vsel %vm58_vm3, %v65_v51, %v67_v57  ;;  %v72_v63 = vsel %vm58_vm3, %v69_v52, %v71_v58  ;;  %v150_v3 = vshrl.u32 %v335_v28, %v144_v45  ;;  %v152_v11 = vshll.u32 %v335_v28, %v143_v21 }
  0x25   :  { %v381_v5 = vmul.u32.u64.low %v368_v20, %v72_v63  ;;  %v382_v6 = vmul.u32.u64.high %v368_v20, %v72_v63, %v381_v5  ;;  %v385_v7 = vmul.u32.u64.low %v368_v20, %v68_v62  ;;  %v386_v8 = vmul.u32.u64.high %v368_v20, %v68_v62, %v385_v7 }
  0x26   :  { %v148_v9 = vor.u32 %v147_v60, %v146_v48  ;;  %v151_v10 = vor.u32 %v150_v3, %v149_v56  ;;  %v153_v12 = vshrl.u32 %v336_v30, %v144_v45  ;;  %v155_v13 = vshll.u32 %v336_v30, %v143_v21 }
  0x27   :  { %v156_v14 = vshrl.u32 %v337_v32, %v144_v45  ;;  %v158_v15 = vshll.u32 %v337_v32, %v143_v21  ;;  %v159_v16 = vshrl.u32 %v338_v40, %v144_v45  ;;  %v80_v17 = vmul.u32 %v368_v20, %v64_v61 }
  0x28   :  { %v154_v18 = vor.u32 %v153_v12, %v152_v11  ;;  %vm161_vm6 = vcmp.lt.s32.totalorder %v372_v34, 1  ;;  %vm162_vm7 = vcmp.lt.s32.totalorder %v372_v34, 2  ;;  %vm82_vm8 = vc.u32 %v382_v6, %v385_v7 }
  0x29   :  { %v83_v19 = vadd.s32 1, %v386_v8  ;;  %v157_v23 = vor.u32 %v156_v14, %v155_v13  ;;  %vm163_vm9 = vcmp.lt.s32.totalorder %v372_v34, 3  ;;  %v160_v24 = vor.u32 %v159_v16, %v158_v15 }
  0x2a   :  { %vm164_vm10 = vcmp.lt.s32.totalorder %v372_v34, 4  ;;  %v165_v25 = vsel %vm161_vm6, %v145_v59, %v148_v9  ;;  %v169_v21 = vsel %vm161_vm6, %v148_v9, %v151_v10  ;;  %v173_v28 = vsel %vm161_vm6, %v151_v10, %v154_v18 }
  0x2b   :  { %v84_v26 = vsel %vm82_vm8, %v83_v19, %v386_v8  ;;  %v166_v20 = vsel %vm164_vm10, %v154_v18, 2102212464  ;;  %v170_v27 = vsel %vm164_vm10, %v157_v23, 920167782  ;;  %v174_v32 = vsel %vm164_vm10, %v160_v24, 1326507024 }
  0x2c   :  { %v85_v29 = vadd.s32 %v84_v26, %v80_v17  ;;  %v167_v30 = vsel %vm163_vm9, %v151_v10, %v166_v20  ;;  %v171_v31 = vsel %vm163_vm9, %v154_v18, %v170_v27  ;;  %v175_v36 = vsel %vm163_vm9, %v157_v23, %v174_v32 }
  0x2d   :  { %v168_v33 = vsel %vm162_vm7, %v165_v25, %v167_v30  ;;  %v172_v35 = vsel %vm162_vm7, %v169_v21, %v171_v31  ;;  %v176_v38 = vsel %vm162_vm7, %v173_v28, %v175_v36  ;;  %v81_v57 = vadd.s32 %v385_v7, %v382_v6 }
  0x2e   :  { %v86_v37 = vadd.s32 536870912, %v85_v29  ;;  %v403_v39 = vmul.u32.u64.low %v370_v22, %v172_v35  ;;  %v404_v40 = vmul.u32.u64.high %v370_v22, %v172_v35, %v403_v39  ;;  %v184_v44 = vmul.u32 %v370_v22, %v168_v33 }
  0x2f   :  { %v407_v41 = vmul.u32.u64.low %v370_v22, %v176_v38  ;;  %v408_v42 = vmul.u32.u64.high %v370_v22, %v176_v38, %v407_v41  ;;  %vm117_vm5 = vweird.f32 %v356_v0  ;;  %vm221_vm9 = vweird.f32 %v358_v1 }
  0x30   :  { %v87_v43 = vshrl.u32 %v86_v37, 30  ;;  %v187_v46 = vadd.s32 1, %v404_v40 }
  0x31   :  { %vm186_vm11 = vc.u32 %v408_v42, %v403_v39  ;;  %v185_v13 = vadd.s32 %v403_v39, %v408_v42 }
  0x32   :  { %v88_v45 = vshll.u32 %v87_v43, 30  ;;  %v188_v34 = vsel %vm186_vm11, %v187_v46, %v404_v40  ;;  %v111_v18 = vsub.s32 4, %v87_v43 }
  0x33   :  { %v189_v48 = vadd.s32 %v188_v34, %v184_v44 }
  0x34   :  { %v89_v47 = vsub.s32 %v85_v29, %v88_v45  ;;  %v112_v27 = vsel %vm27_vm14, %v111_v18, %v87_v43 }
  0x35   :  { %v190_v50 = vadd.s32 536870912, %v189_v48  ;;  %v114_v2 = vsel %vm419_vm15, 0, %v112_v27 }
  0x36   :  { %v91_v49 = vsub.s32 0, %v89_v47  ;;  %v118_v35 = vadd.s32 3, %v114_v2 }
  0x37   :  { %v191_v52 = vshrl.u32 %v190_v50, 30 }
  0x38   :  { %v253_v51 = vmin.u32 %v91_v49, %v89_v47  ;;  %v119_v40 = vand.u32 3, %v118_v35 }
  0x39   :  { %v192_v54 = vshll.u32 %v191_v52, 30  ;;  %v215_v33 = vsub.s32 4, %v191_v52 }
  0x3a   :  { %v93_v53 = vclz %v253_v51  ;;  %vm124_vm2 = vcmp.eq.s32.totalorder %v119_v40, 2  ;;  %vm121_vm3 = vcmp.eq.s32.totalorder %v119_v40, 0  ;;  %vm120_vm4 = vcmp.lt.s32.totalorder %v119_v40, 2 }
  0x3b   :  { %v193_v56 = vsub.s32 %v189_v48, %v192_v54  ;;  %v216_v38 = vsel %vm131_vm0, %v215_v33, %v191_v52 }
  0x3c   :  { %v254_v55 = vadd.s32 4294967294, %v93_v53  ;;  %v218_v41 = vsel %vm130_vm1, 0, %v216_v38 }
  0x3d   :  { %v195_v58 = vsub.s32 0, %v193_v56  ;;  %v222_v45 = vadd.s32 3, %v218_v41 }
  0x3e   :  { %vm255_vm12 = vcmp.lt.s32.totalorder %v254_v55, 0 }
  0x3f   :  { %v96_v22 = vsel %vm255_vm12, 0, %v254_v55  ;;  %v257_v62 = vmin.u32 %v195_v58, %v193_v56  ;;  %v223_v48 = vand.u32 3, %v222_v45 }
  0x40   :  { %v97_v59 = vsub.s32 32, %v96_v22  ;;  %v98_v60 = vshll.u32 %v89_v47, %v96_v22  ;;  %v101_v61 = vsub.s32 4294967266, %v96_v22 }
  0x41   :  { %v197_v5 = vclz %v257_v62  ;;  %vm228_vm6 = vcmp.eq.s32.totalorder %v223_v48, 2  ;;  %vm225_vm7 = vcmp.eq.s32.totalorder %v223_v48, 0  ;;  %vm224_vm8 = vcmp.lt.s32.totalorder %v223_v48, 2 }
  0x42   :  { %v99_v63 = vshrl.u32 %v81_v57, %v97_v59  ;;  %v102_v3 = vadd.s32 127, %v101_v61 }
  0x43   :  { %v258_v10 = vadd.s32 4294967294, %v197_v5 }
  0x44   :  { %v100_v8 = vor.u32 %v99_v63, %v98_v60  ;;  %v103_v9 = vshll.u32 %v102_v3, 23 }
  0x45   :  { %vm259_vm13 = vcmp.lt.s32.totalorder %v258_v10, 0 }
  0x46   :  { %v104_v11 = vor.u32 4788187, %v103_v9  ;;  %v107_v12 = vcvt.s32.f32 %v100_v8  ;;  %v200_v6 = vsel %vm259_vm13, 0, %v258_v10 }
  0x47   :  { %v201_v7 = vsub.s32 32, %v200_v6  ;;  %v202_v15 = vshll.u32 %v193_v56, %v200_v6  ;;  %v205_v16 = vsub.s32 4294967266, %v200_v6 }
  0x48   :  { %v105_v14 = vand.u32 2147483647, %v104_v11 }
  0x49   :  { %v203_v19 = vshrl.u32 %v185_v13, %v201_v7  ;;  %v206_v23 = vadd.s32 127, %v205_v16 }
  0x4a   :  { %v108_v17 = vmul.f32 %v107_v12, %v105_v14 }
  0x4b   :  { %v204_v21 = vor.u32 %v203_v19, %v202_v15  ;;  %v207_v26 = vshll.u32 %v206_v23, 23 }
  0x4c   :  { %v109_v25 = vxor.u32 2147483648, %v108_v17 }
  0x4d   :  { %v208_v29 = vor.u32 4788187, %v207_v26  ;;  %v211_v30 = vcvt.s32.f32 %v204_v21 }
  0x4e   :  { %v110_v20 = vsel %vm27_vm14, %v109_v25, %v108_v17 }
  0x4f   :  { %v113_v28 = vsel %vm419_vm15, %v356_v0, %v110_v20  ;;  %v209_v31 = vand.u32 2147483647, %v208_v29 }
  0x50   :  { %278 = vcosq.f32 %v113_v28 }
  0x51   :  { %280 = vsinq.f32 %v113_v28  ;;  %v212_v32 = vmul.f32 %v211_v30, %v209_v31 }
  0x53   :  { %v213_v36 = vxor.u32 2147483648, %v212_v32 }
  0x55   :  { %v214_v37 = vsel %vm131_vm0, %v213_v36, %v212_v32 }
  0x56   :  { %v217_v39 = vsel %vm130_vm1, %v358_v1, %v214_v37 }
  0x57   :  { %282 = vcosq.f32 %v217_v39 }
  0x58   :  { %284 = vsinq.f32 %v217_v39 }
  0x5d   :  { %v279_v42 = vpop.eup %278 }
  0x5e   :  { %v281_v43 = vpop.eup %280  ;;  %v125_v44 = vxor.u32 2147483648, %v279_v42 }
  0x5f   :  { %v122_v46 = vxor.u32 2147483648, %v281_v43 }
  0x60   :  { %v126_v4 = vsel %vm124_vm2, %v125_v44, %v281_v43 }
  0x61   :  { %v123_v47 = vsel %vm121_vm3, %v279_v42, %v122_v46 }
  0x62   :  { %v127_v34 = vsel %vm120_vm4, %v123_v47, %v126_v4 }
  0x63   :  { %v128_v49 = vsel %vm117_vm5, nan, %v127_v34 }
  0x64   :  { %233 = vst [vmem:[#allocation5] sm:$0xff] %v128_v49  ;;  %v283_v50 = vpop.eup %282 }
  0x65   :  { %v285_v51 = vpop.eup %284  ;;  %v229_v52 = vxor.u32 2147483648, %v283_v50 }
  0x66   :  { %v226_v53 = vxor.u32 2147483648, %v285_v51 }
  0x67   :  { %v230_v54 = vsel %vm228_vm6, %v229_v52, %v285_v51 }
  0x68   :  { %v227_v55 = vsel %vm225_vm7, %v283_v50, %v226_v53 }
  0x69   :  { %v231_v0 = vsel %vm224_vm8, %v227_v55, %v230_v54 }
  0x6a   :  { %v232_v56 = vsel %vm221_vm9, nan, %v231_v0 }
  0x6b   :  { %234 = vst [vmem:[#allocation5 + $0x8] sm:$0xff] %v232_v56 }
  0x6c   :  { %317 = shalt.err (!%p314_p9)
}
  0x6d   :  { %246 = dma.vmem_to_hbm [thread:$0]  %s241_s13, 256, %s441_s1, [#allocation4], %s331_s9, %s331_s9, %s332_s10  }
  0x6e   :  { %328 = dma.done.wait [#allocation4], 256  }
  0x6f   :  { %329 = vsyncadd [#allocation4], 4294967040 }
  0x70   :  { %250 = vsyncpa [#allocation3], 1 }
  0x71   :  { %251 = vsyncpa [#allocation4], 1 }

</bundles_post_ra>
